<compile_context>
chip_gen: v5e
topology: v5e:2x2
jax: 0.10.0
libtpu: 0.0.40
codegen_flags: <defaults>
</compile_context>

<pallas_src>
import functools

import jax
import jax.numpy as jnp
from jax.experimental import pallas as pl
from jax.experimental.pallas import tpu as pltpu


def _round_up(x: int, m: int) -> int:
    return ((x + m - 1) // m) * m


def tile_encoder_kernel(x_ref, w1_ref, b1_ref, w2_ref, b2_ref, o_ref, *,
                        tiles_per_block, p_pad, p_real):
    # x_ref : [TB*p_pad, d_in_p] bf16   flattened patches (one block of tiles)
    # w1_ref: [d_in_p, hid_p]    bf16   patch-embedding weight (conv as matmul)
    # b1_ref: [1, hid_p]         f32
    # w2_ref: [hid_p, feat_p]    f32    projection head (kept f32: M is small)
    # b2_ref: [1, feat_p]        f32
    # o_ref : [TB, feat_p]       f32
    h = jnp.dot(x_ref[...], w1_ref[...], preferred_element_type=jnp.float32)
    h = jnp.maximum(h + b1_ref[...], 0.0)                 # bias + ReLU (VPU)

    # Per-tile mean over patches: sublane-aligned reshape + sum (VPU/XLU slots
    # idle under the MXU).  Padded patch rows (ReLU(b1) != 0) are masked out.
    hid = h.shape[-1]
    h3 = h.reshape(tiles_per_block, p_pad, hid)
    if p_pad != p_real:
        row = jax.lax.broadcasted_iota(jnp.int32, h3.shape, dimension=1)
        h3 = jnp.where(row < p_real, h3, 0.0)
    pooled = jnp.sum(h3, axis=1) * (1.0 / p_real)         # f32

    out = jnp.dot(pooled, w2_ref[...], preferred_element_type=jnp.float32)
    o_ref[...] = (out + b2_ref[...]).astype(o_ref.dtype)


def slide_feature_extractor_forward(x_nchw, params):
    """Forward pass: x_nchw [N, C, H, W] float32 -> features [N, feat_dim]."""
    w_conv = params["w_conv"]   # [hidden, C, p, p]  (PyTorch Conv2d layout)
    b_conv = params["b_conv"]   # [hidden]
    w_head = params["w_head"]   # [feat, hidden]     (PyTorch Linear layout)
    b_head = params["b_head"]   # [feat]

    N, C, H, W = x_nchw.shape
    hidden, _, p, _ = w_conv.shape
    feat = w_head.shape[0]
    nph, npw = H // p, W // p
    P = nph * npw
    d_in = C * p * p

    # Lane-dense padded dims (multiples of 128); patches-per-tile padded to a
    # multiple of 8 so the in-kernel reshape is a pure sublane split.
    d_in_p = _round_up(d_in, 128)
    hid_p = _round_up(hidden, 128)
    feat_p = _round_up(feat, 128)
    p_pad = _round_up(P, 8)

    # ---- Per-generation VMEM budget -------------------------------------
    try:
        vmem_cap = int(pltpu.get_tpu_info().vmem_capacity_bytes)
    except Exception:  # conservative default if query unavailable
        vmem_cap = 128 * 1024 * 1024
    # ~48 MiB on v7x (64 MiB/TC), 96 MiB on v5e/v6e (128 MiB).
    vmem_budget = min(int(0.75 * vmem_cap), 96 * 1024 * 1024)

    # Deeper input buffering only when arithmetic intensity is low (BW-bound).
    stream_bufs_target = 3 if hid_p <= 256 else 2

    # Resident, single-buffered weights/biases.
    w_bytes = d_in_p * hid_p * 2 + hid_p * feat_p * 4 + (hid_p + feat_p) * 4

    # ---- Tile-block (tb) selection from the VMEM budget ------------------
    # TODO(synk): for very large hid_p on v7x, chunk the patch-embed matmul
    # inside the kernel (fori_loop over patch-row chunks, pool-accumulate) so
    # the live f32 `h` slab stays bounded and tb can stay large.
    per_tile = (stream_bufs_target * p_pad * d_in_p * 2   # streamed patches
                + p_pad * hid_p * 4                       # live f32 h
                + 2 * feat_p * 4)                         # output (2 bufs)
    avail = max(vmem_budget - w_bytes, per_tile)
    tb = int(min(256, max(1, avail // per_tile)))

    if tb >= N:
        if N >= 16:
            # Keep >= 2 grid blocks so a 2-TC chip (v7x) shares the work.
            tb = _round_up((N + 1) // 2, 8)
        else:
            tb = N
    else:
        tb = max(8, (tb // 8) * 8)
    n_pad = _round_up(N, tb)
    num_blocks = n_pad // tb
    stream_bufs = 1 if num_blocks == 1 else stream_bufs_target

    # ---- Single HBM materialization of the patch slab --------------------
    # transpose + bf16 cast + zero-pad fuse into one copy into a pre-padded
    # buffer (no extra jnp.pad round trip of the full slab).
    # TODO(synk): fold the patch extraction into the kernel DMA (index_map over
    # the raw NCHW image) to drop this materialization entirely.
    patch_vals = (
        x_nchw.reshape(N, C, nph, p, npw, p)
        .transpose(0, 2, 4, 1, 3, 5)           # [N, nph, npw, C, p, p]
        .reshape(N, P, d_in)
        .astype(jnp.bfloat16)
    )
    if (n_pad, p_pad, d_in_p) == (N, P, d_in):
        patches = patch_vals.reshape(N * P, d_in)
    else:
        patches = (
            jnp.zeros((n_pad, p_pad, d_in_p), jnp.bfloat16)
            .at[:N, :P, :d_in].set(patch_vals)
            .reshape(n_pad * p_pad, d_in_p)
        )

    w1 = (jnp.zeros((d_in_p, hid_p), jnp.bfloat16)
          .at[:d_in, :hidden].set(w_conv.reshape(hidden, d_in).T
                                  .astype(jnp.bfloat16)))
    b1 = (jnp.zeros((1, hid_p), jnp.float32)
          .at[:, :hidden].set(b_conv.astype(jnp.float32)[None, :]))
    w2 = (jnp.zeros((hid_p, feat_p), jnp.float32)
          .at[:hidden, :feat].set(w_head.T.astype(jnp.float32)))
    b2 = (jnp.zeros((1, feat_p), jnp.float32)
          .at[:, :feat].set(b_head.astype(jnp.float32)[None, :]))

    kernel = functools.partial(tile_encoder_kernel, tiles_per_block=tb,
                               p_pad=p_pad, p_real=P)

    # Actual per-step working set (buffer counts already included; no 2x).
    block_bytes = (stream_bufs * tb * p_pad * d_in_p * 2
                   + w_bytes
                   + tb * p_pad * hid_p * 4
                   + 2 * tb * feat_p * 4)
    vmem_limit = int(min(vmem_budget,
                         max(32 * 1024 * 1024, int(1.25 * block_bytes))))

    flops = 2 * n_pad * p_pad * d_in_p * hid_p + 2 * n_pad * hid_p * feat_p
    bytes_accessed = (patches.size * 2 + w1.size * 2 + w2.size * 4
                      + b1.size * 4 + b2.size * 4 + n_pad * feat_p * 4)

    def _build(use_pipeline_mode):
        if use_pipeline_mode:
            resident = dict(pipeline_mode=pl.Buffered(1))
            stream = dict(pipeline_mode=pl.Buffered(stream_bufs))
        else:
            resident = {}
            stream = {}
        in_specs = [
            pl.BlockSpec((tb * p_pad, d_in_p), lambda i: (i, 0), **stream),
            pl.BlockSpec((d_in_p, hid_p), lambda i: (0, 0), **resident),
            pl.BlockSpec((1, hid_p), lambda i: (0, 0), **resident),
            pl.BlockSpec((hid_p, feat_p), lambda i: (0, 0), **resident),
            pl.BlockSpec((1, feat_p), lambda i: (0, 0), **resident),
        ]
        return pl.pallas_call(
            kernel,
            out_shape=jax.ShapeDtypeStruct((n_pad, feat_p), jnp.float32),
            grid_spec=pltpu.PrefetchScalarGridSpec(
                num_scalar_prefetch=0,
                grid=(num_blocks,),
                in_specs=in_specs,
                out_specs=pl.BlockSpec((tb, feat_p), lambda i: (i, 0)),
            ),
            compiler_params=pltpu.CompilerParams(
                dimension_semantics=("parallel",),
                vmem_limit_bytes=vmem_limit,
            ),
            cost_estimate=pl.CostEstimate(flops=int(flops), transcendentals=0,
                                          bytes_accessed=int(bytes_accessed)),
        )

    try:
        out = _build(True)(patches, w1, b1, w2, b2)
    except Exception:
        # Fallback for runtimes where pipeline_mode=pl.Buffered is unsupported:
        # identical kernel, default (double) buffering on every operand.
        out = _build(False)(patches, w1, b1, w2, b2)

    return out[:N, :feat]


def make_params(key, c_in, patch, hidden, feat):
    k1, k2, k3, k4 = jax.random.split(key, 4)
    return {
        "w_conv": 0.05 * jax.random.normal(k1, (hidden, c_in, patch, patch), jnp.float32),
        "b_conv": 0.05 * jax.random.normal(k2, (hidden,), jnp.float32),
        "w_head": 0.05 * jax.random.normal(k3, (feat, hidden), jnp.float32),
        "b_head": 0.05 * jax.random.normal(k4, (feat,), jnp.float32),
    }


def reference_forward(x_nchw, params):
    """Pure-JAX f32 reference (mirrors the PyTorch tile-encoder semantics)."""
    w_conv, b_conv = params["w_conv"], params["b_conv"]
    w_head, b_head = params["w_head"], params["b_head"]
    N, C, H, W = x_nchw.shape
    hidden, _, p, _ = w_conv.shape
    nph, npw = H // p, W // p
    patches = (
        x_nchw.reshape(N, C, nph, p, npw, p)
        .transpose(0, 2, 4, 1, 3, 5)
        .reshape(N, nph * npw, C * p * p)
    )
    h = jnp.maximum(patches @ w_conv.reshape(hidden, -1).T + b_conv, 0.0)
    pooled = h.mean(axis=1)
    return pooled @ w_head.T + b_head


if __name__ == "__main__":
    key = jax.random.PRNGKey(0)
    kx, kp = jax.random.split(key)

    # Small, module-consistent shapes: batch=2, channels=4, spatial=16,
    # patch=4 (=> 16 patches/tile), hidden=32, feat_dim=64.
    N, C, H, W = 2, 4, 16, 16
    patch, hidden, feat = 4, 32, 64

    x = jax.random.normal(kx, (N, C, H, W), jnp.float32)
    params = make_params(kp, C, patch, hidden, feat)

    out = slide_feature_extractor_forward(x, params)
    out = jax.block_until_ready(out)

    ref = reference_forward(x, params)
    assert out.shape == (N, feat)
    # Tolerance relaxed vs a pure-f32 path: patch-embed matmul inputs are bf16
    # (f32 accumulation); the head matmul is full f32.
    assert jnp.allclose(out, ref, atol=3e-2, rtol=3e-2), float(
        jnp.max(jnp.abs(out - ref)))

    # TODO(synk): forward_slide()/slide_encoder and get_transforms() are
    # abstract in the PyTorch module (build_encoders raises
    # NotImplementedError); only the tile-encoder forward path is realized.
    print("KERNEL_OK")
</pallas_src>

<mosaic_0001>
module attributes {stable_mosaic.version = 11 : i64} {
  func.func @tile_encoder_kernel(%arg0: i32, %arg1: memref<32x128xbf16, #tpu.memory_space<vmem>>, %arg2: memref<128x128xbf16, #tpu.memory_space<vmem>>, %arg3: memref<1x128xf32, #tpu.memory_space<vmem>>, %arg4: memref<128x128xf32, #tpu.memory_space<vmem>>, %arg5: memref<1x128xf32, #tpu.memory_space<vmem>>, %arg6: memref<2x128xf32, #tpu.memory_space<vmem>>) attributes {dimension_semantics = [#tpu.dimension_semantics<parallel>], iteration_bounds = array<i64: 1>, scalar_prefetch = 0 : i64, scratch_operands = 0 : i64, tpu.core_type = #tpu.core_type<tc>, window_params = [{pipeline_mode = #tpu.pipeline_mode<synchronous>, transform_indices = @transform_0, window_bounds = array<i64: 32, 128>}, {pipeline_mode = #tpu.pipeline_mode<synchronous>, transform_indices = @transform_1, window_bounds = array<i64: 128, 128>}, {pipeline_mode = #tpu.pipeline_mode<synchronous>, transform_indices = @transform_2, window_bounds = array<i64: 1, 128>}, {pipeline_mode = #tpu.pipeline_mode<synchronous>, transform_indices = @transform_3, window_bounds = array<i64: 128, 128>}, {pipeline_mode = #tpu.pipeline_mode<synchronous>, transform_indices = @transform_4, window_bounds = array<i64: 1, 128>}, {transform_indices = @transform_5, window_bounds = array<i64: 2, 128>}]} {
    %c0 = arith.constant 0 : index
    %c0_0 = arith.constant 0 : index
    %0 = vector.load %arg1[%c0, %c0_0] : memref<32x128xbf16, #tpu.memory_space<vmem>>, vector<32x128xbf16>
    %c0_1 = arith.constant 0 : index
    %c0_2 = arith.constant 0 : index
    %1 = vector.load %arg2[%c0_1, %c0_2] : memref<128x128xbf16, #tpu.memory_space<vmem>>, vector<128x128xbf16>
    %cst = arith.constant dense<0.000000e+00> : vector<32x128xf32>
    %2 = tpu.matmul %0, %1, %cst {dimension_numbers = #tpu.dot_dimension_numbers<[1], [0], [0], [1], [0, 0, 1, 1], [], []>} : vector<32x128xbf16>, vector<128x128xbf16>, vector<32x128xf32> -> vector<32x128xf32>
    %c0_3 = arith.constant 0 : index
    %c0_4 = arith.constant 0 : index
    %3 = vector.load %arg3[%c0_3, %c0_4] : memref<1x128xf32, #tpu.memory_space<vmem>>, vector<1x128xf32>
    %4 = vector.broadcast %3 : vector<1x128xf32> to vector<32x128xf32>
    %5 = arith.addf %2, %4 : vector<32x128xf32>
    %cst_5 = arith.constant 0.000000e+00 : f32
    %6 = vector.broadcast %cst_5 : f32 to vector<32x128xf32>
    %7 = arith.maximumf %5, %6 : vector<32x128xf32>
    %8 = vector.shape_cast %7 : vector<32x128xf32> to vector<2x16x128xf32>
    %cst_6 = arith.constant dense<0.000000e+00> : vector<2x128xf32>
    %9 = vector.multi_reduction <add>, %8, %cst_6 [1] : vector<2x16x128xf32> to vector<2x128xf32>
    %cst_7 = arith.constant 6.250000e-02 : f32
    %10 = vector.broadcast %cst_7 : f32 to vector<2x128xf32>
    %11 = arith.mulf %9, %10 : vector<2x128xf32>
    %c0_8 = arith.constant 0 : index
    %c0_9 = arith.constant 0 : index
    %12 = vector.load %arg4[%c0_8, %c0_9] : memref<128x128xf32, #tpu.memory_space<vmem>>, vector<128x128xf32>
    %cst_10 = arith.constant dense<0.000000e+00> : vector<2x128xf32>
    %13 = tpu.matmul %11, %12, %cst_10 {dimension_numbers = #tpu.dot_dimension_numbers<[1], [0], [0], [1], [0, 0, 1, 1], [], []>} : vector<2x128xf32>, vector<128x128xf32>, vector<2x128xf32> -> vector<2x128xf32>
    %c0_11 = arith.constant 0 : index
    %c0_12 = arith.constant 0 : index
    %14 = vector.load %arg5[%c0_11, %c0_12] : memref<1x128xf32, #tpu.memory_space<vmem>>, vector<1x128xf32>
    %15 = vector.broadcast %14 : vector<1x128xf32> to vector<2x128xf32>
    %16 = arith.addf %13, %15 : vector<2x128xf32>
    %c0_13 = arith.constant 0 : index
    %c0_14 = arith.constant 0 : index
    %17 = vector.load %arg6[%c0_13, %c0_14] : memref<2x128xf32, #tpu.memory_space<vmem>>, vector<2x128xf32>
    tpu.vector_store %arg6[%c0_13, %c0_14], %16 {strides = array<i32>} : memref<2x128xf32, #tpu.memory_space<vmem>>, vector<2x128xf32>,
    return
  }
  func.func @transform_0(%arg0: i32) -> (i32, i32) {
    %c0_i32 = arith.constant 0 : i32
    %c0_i32_0 = arith.constant 0 : i32
    return %arg0, %c0_i32 : i32, i32
  }
  func.func @transform_1(%arg0: i32) -> (i32, i32) {
    %c0_i32 = arith.constant 0 : i32
    %c0_i32_0 = arith.constant 0 : i32
    %c0_i32_1 = arith.constant 0 : i32
    return %c0_i32, %c0_i32_0 : i32, i32
  }
  func.func @transform_2(%arg0: i32) -> (i32, i32) {
    %c0_i32 = arith.constant 0 : i32
    %c0_i32_0 = arith.constant 0 : i32
    %c0_i32_1 = arith.constant 0 : i32
    return %c0_i32, %c0_i32_0 : i32, i32
  }
  func.func @transform_3(%arg0: i32) -> (i32, i32) {
    %c0_i32 = arith.constant 0 : i32
    %c0_i32_0 = arith.constant 0 : i32
    %c0_i32_1 = arith.constant 0 : i32
    return %c0_i32, %c0_i32_0 : i32, i32
  }
  func.func @transform_4(%arg0: i32) -> (i32, i32) {
    %c0_i32 = arith.constant 0 : i32
    %c0_i32_0 = arith.constant 0 : i32
    %c0_i32_1 = arith.constant 0 : i32
    return %c0_i32, %c0_i32_0 : i32, i32
  }
  func.func @transform_5(%arg0: i32) -> (i32, i32) {
    %c0_i32 = arith.constant 0 : i32
    %c0_i32_0 = arith.constant 0 : i32
    return %arg0, %c0_i32 : i32, i32
  }
}

module attributes {stable_mosaic.version = 11 : i64} {
  func.func @tile_encoder_kernel(%arg0: i32, %arg1: memref<32x128xbf16, #tpu.memory_space<vmem>>, %arg2: memref<128x128xbf16, #tpu.memory_space<vmem>>, %arg3: memref<1x128xf32, #tpu.memory_space<vmem>>, %arg4: memref<128x128xf32, #tpu.memory_space<vmem>>, %arg5: memref<1x128xf32, #tpu.memory_space<vmem>>, %arg6: memref<2x128xf32, #tpu.memory_space<vmem>>) attributes {dimension_semantics = [#tpu.dimension_semantics<parallel>], iteration_bounds = array<i64: 1>, scalar_prefetch = 0 : i64, scratch_operands = 0 : i64, tpu.core_type = #tpu.core_type<tc>, window_params = [{transform_indices = @transform_0, window_bounds = array<i64: 32, 128>}, {pipeline_mode = #tpu.pipeline_mode<synchronous>, transform_indices = @transform_1, window_bounds = array<i64: 128, 128>}, {pipeline_mode = #tpu.pipeline_mode<synchronous>, transform_indices = @transform_2, window_bounds = array<i64: 1, 128>}, {pipeline_mode = #tpu.pipeline_mode<synchronous>, transform_indices = @transform_3, window_bounds = array<i64: 128, 128>}, {pipeline_mode = #tpu.pipeline_mode<synchronous>, transform_indices = @transform_4, window_bounds = array<i64: 1, 128>}, {transform_indices = @transform_5, window_bounds = array<i64: 2, 128>}]} {
    %c0 = arith.constant 0 : index
    %c0_0 = arith.constant 0 : index
    %0 = vector.load %arg1[%c0, %c0_0] : memref<32x128xbf16, #tpu.memory_space<vmem>>, vector<32x128xbf16>
    %c0_1 = arith.constant 0 : index
    %c0_2 = arith.constant 0 : index
    %1 = vector.load %arg2[%c0_1, %c0_2] : memref<128x128xbf16, #tpu.memory_space<vmem>>, vector<128x128xbf16>
    %cst = arith.constant dense<0.000000e+00> : vector<32x128xf32>
    %2 = tpu.matmul %0, %1, %cst {dimension_numbers = #tpu.dot_dimension_numbers<[1], [0], [0], [1], [0, 0, 1, 1], [], []>} : vector<32x128xbf16>, vector<128x128xbf16>, vector<32x128xf32> -> vector<32x128xf32>
    %c0_3 = arith.constant 0 : index
    %c0_4 = arith.constant 0 : index
    %3 = vector.load %arg3[%c0_3, %c0_4] : memref<1x128xf32, #tpu.memory_space<vmem>>, vector<1x128xf32>
    %4 = vector.broadcast %3 : vector<1x128xf32> to vector<32x128xf32>
    %5 = arith.addf %2, %4 : vector<32x128xf32>
    %cst_5 = arith.constant 0.000000e+00 : f32
    %6 = vector.broadcast %cst_5 : f32 to vector<32x128xf32>
    %7 = arith.maximumf %5, %6 : vector<32x128xf32>
    %8 = vector.shape_cast %7 : vector<32x128xf32> to vector<2x16x128xf32>
    %cst_6 = arith.constant dense<0.000000e+00> : vector<2x128xf32>
    %9 = vector.multi_reduction <add>, %8, %cst_6 [1] : vector<2x16x128xf32> to vector<2x128xf32>
    %cst_7 = arith.constant 6.250000e-02 : f32
    %10 = vector.broadcast %cst_7 : f32 to vector<2x128xf32>
    %11 = arith.mulf %9, %10 : vector<2x128xf32>
    %c0_8 = arith.constant 0 : index
    %c0_9 = arith.constant 0 : index
    %12 = vector.load %arg4[%c0_8, %c0_9] : memref<128x128xf32, #tpu.memory_space<vmem>>, vector<128x128xf32>
    %cst_10 = arith.constant dense<0.000000e+00> : vector<2x128xf32>
    %13 = tpu.matmul %11, %12, %cst_10 {dimension_numbers = #tpu.dot_dimension_numbers<[1], [0], [0], [1], [0, 0, 1, 1], [], []>} : vector<2x128xf32>, vector<128x128xf32>, vector<2x128xf32> -> vector<2x128xf32>
    %c0_11 = arith.constant 0 : index
    %c0_12 = arith.constant 0 : index
    %14 = vector.load %arg5[%c0_11, %c0_12] : memref<1x128xf32, #tpu.memory_space<vmem>>, vector<1x128xf32>
    %15 = vector.broadcast %14 : vector<1x128xf32> to vector<2x128xf32>
    %16 = arith.addf %13, %15 : vector<2x128xf32>
    %c0_13 = arith.constant 0 : index
    %c0_14 = arith.constant 0 : index
    %17 = vector.load %arg6[%c0_13, %c0_14] : memref<2x128xf32, #tpu.memory_space<vmem>>, vector<2x128xf32>
    tpu.vector_store %arg6[%c0_13, %c0_14], %16 {strides = array<i32>} : memref<2x128xf32, #tpu.memory_space<vmem>>, vector<2x128xf32>,
    return
  }
  func.func @transform_0(%arg0: i32) -> (i32, i32) {
    %c0_i32 = arith.constant 0 : i32
    %c0_i32_0 = arith.constant 0 : i32
    return %arg0, %c0_i32 : i32, i32
  }
  func.func @transform_1(%arg0: i32) -> (i32, i32) {
    %c0_i32 = arith.constant 0 : i32
    %c0_i32_0 = arith.constant 0 : i32
    %c0_i32_1 = arith.constant 0 : i32
    return %c0_i32, %c0_i32_0 : i32, i32
  }
  func.func @transform_2(%arg0: i32) -> (i32, i32) {
    %c0_i32 = arith.constant 0 : i32
    %c0_i32_0 = arith.constant 0 : i32
    %c0_i32_1 = arith.constant 0 : i32
    return %c0_i32, %c0_i32_0 : i32, i32
  }
  func.func @transform_3(%arg0: i32) -> (i32, i32) {
    %c0_i32 = arith.constant 0 : i32
    %c0_i32_0 = arith.constant 0 : i32
    %c0_i32_1 = arith.constant 0 : i32
    return %c0_i32, %c0_i32_0 : i32, i32
  }
  func.func @transform_4(%arg0: i32) -> (i32, i32) {
    %c0_i32 = arith.constant 0 : i32
    %c0_i32_0 = arith.constant 0 : i32
    %c0_i32_1 = arith.constant 0 : i32
    return %c0_i32, %c0_i32_0 : i32, i32
  }
  func.func @transform_5(%arg0: i32) -> (i32, i32) {
    %c0_i32 = arith.constant 0 : i32
    %c0_i32_0 = arith.constant 0 : i32
    return %arg0, %c0_i32 : i32, i32
  }
}

</mosaic_0001>

<bundles_post_ra>
// kernel: tpu_custom_call.1
= control target key start
LH: loop header
LB: loop body
LE: loop exit
PB: predicated region body
PF: predicated region fallthrough
CT: control target
= control target key end

     0   :  { %10 = vsyncpa [#allocation3], 0  ;;  %s481_s0 = inlined_call_operand.hbm [shape: bf16[32,128], index: 0, kind: input, shape index: {}]   ;;  %s482_s1 = inlined_call_operand.hbm [shape: bf16[128,128], index: 1, kind: input, shape index: {}]   ;;  %s483_s2 = inlined_call_operand.vmem [shape: f32[1,128], index: 2, kind: input, shape index: {}]   ;;  %s484_s3 = inlined_call_operand.hbm [shape: f32[128,128], index: 3, kind: input, shape index: {}]   ;;  %s485_s4 = inlined_call_operand.vmem [shape: f32[1,128], index: 4, kind: input, shape index: {}]   ;;  %s486_s5 = inlined_call_operand.hbm [shape: f32[2,128], index: 5, kind: output, shape index: {}]  }
   0x1   :  { %11 = vsyncpa [#allocation6], 0 }
   0x2   :  { %12 = vsyncpa [#allocation4], 0  ;;  %s30_s20 = sshll.u32 %s482_s1, 4  ;;  %s425_s21 = smov [#allocation5]   ;;  %s31_s20 = int_to_ptr.hbm [resolvable:$true] %s30_s20 }
   0x3   :  { %s32_s22 = sshll.u32 %s425_s21, 4  ;;  %s17_s25 = sshll.u32 %s481_s0, 4  ;;  %s33_s22 = int_to_ptr.vmem [resolvable:$true] %s32_s22  ;;  %s18_s25 = int_to_ptr.hbm [resolvable:$true] %s17_s25 }
   0x4   :  { %s426_s26 = smov 64   ;;  %s427_s27 = smov 4  }
   0x5   :  { %38 = dma.hbm_to_vmem [thread:$0]  %s31_s20, 1024, %s33_s22, [#allocation6], %s426_s26, %s426_s26, %s427_s27  }
   0x6   :  { %s428_s28 = smov [#allocation2]   ;;  %s45_s7 = sshll.u32 %s484_s3, 4  ;;  %s46_s7 = int_to_ptr.hbm [resolvable:$true] %s45_s7 }
   0x7   :  { %s19_s29 = sshll.u32 %s428_s28, 4  ;;  %s429_s1 = smov [#allocation7]   ;;  %s20_s29 = int_to_ptr.vmem [resolvable:$true] %s19_s29 }
   0x8   :  { %25 = dma.hbm_to_vmem [thread:$0]  %s18_s25, 256, %s20_s29, [#allocation3], %s426_s26, %s426_s26, %s427_s27  }
   0x9   :  { %s47_s8 = sshll.u32 %s429_s1, 4  ;;  %s430_s9 = smov 128   ;;  %s48_s8 = int_to_ptr.vmem [resolvable:$true] %s47_s8 }
   0xa   :  { %s431_s10 = smov 8  }
   0xb   :  { %53 = dma.hbm_to_vmem [thread:$0]  %s46_s7, 2048, %s48_s8, [#allocation6], %s430_s9, %s430_s9, %s431_s10  }
   0xc   :  { %419 = dma.done.wait [#allocation3], 256  }
   0xd   :  { %420 = vsyncadd [#allocation3], 4294967040 }
   0xe   :  { %421 = dma.done.wait [#allocation6], 3072  }
   0xf   :  { %422 = vsyncadd [#allocation6], 4294964224  ;;  %v304_v0 = vld [vmem:[#allocation5 + $0x38] sm:$0xff]  ;;  %v303_v1 = vld [vmem:[#allocation5 + $0x30] sm:$0xff]  ;;  %vm213_vm0 = vcmask 1041409   ;;  %s432_s12 = smov [#allocation8]  }
  0x10   :  { %152 = vmatpush.bf16.msra.mxu0 %v304_v0  ;;  %305 = vmatpush.bf16.msra.mxu2 %v304_v0  ;;  %v302_v2 = vld [vmem:[#allocation5 + $0x28] sm:$0xff]  ;;  %v301_v3 = vld [vmem:[#allocation5 + $0x20] sm:$0xff]  ;;  %v300_v4 = vld [vmem:[#allocation5 + $0x18] sm:$0xff]  ;;  %s242_s13 = sshll.u32 %s432_s12, 4  ;;  %s244_s16 = sshll.u32 %s486_s5, 4  ;;  %s243_s13 = int_to_ptr.vmem [resolvable:$true] %s242_s13  ;;  %s245_s16 = int_to_ptr.hbm [resolvable:$true] %s244_s16 }
  0x11   :  { %v299_v5 = vld [vmem:[#allocation5 + $0x10] sm:$0xff]  ;;  %v298_v6 = vld [vmem:[#allocation5 + $0x8] sm:$0xff]  ;;  %v297_v7 = vld [vmem:[#allocation5] sm:$0xff] }
  0x12   :  { %v295_v8 = vld [vmem:[#allocation2] sm:$0xff]  ;;  %v296_v9 = vld [vmem:[#allocation2 + $0x8] sm:$0xff]  ;;  %v204_v12 = vld [vmem:[#allocation7 + $0x68] sm:$0xff] }
  0x13   :  { %v206_v10 = vld [vmem:[#allocation7 + $0x78] sm:$0xff]  ;;  %v205_v11 = vld [vmem:[#allocation7 + $0x70] sm:$0xff]  ;;  %v203_v13 = vld [vmem:[#allocation7 + $0x60] sm:$0xff] }
  0x14   :  { %153 = vmatpush.bf16.msra.mxu0 %v303_v1  ;;  %306 = vmatpush.bf16.msra.mxu2 %v303_v1  ;;  %v202_v14 = vld [vmem:[#allocation7 + $0x58] sm:$0xff]  ;;  %v201_v15 = vld [vmem:[#allocation7 + $0x50] sm:$0xff]  ;;  %v200_v16 = vld [vmem:[#allocation7 + $0x48] sm:$0xff] }
  0x15   :  { %216 = vmatpush.msra.mxu1 %v206_v10  ;;  %v199_v17 = vld [vmem:[#allocation7 + $0x40] sm:$0xff]  ;;  %v198_v18 = vld [vmem:[#allocation7 + $0x38] sm:$0xff]  ;;  %v197_v19 = vld [vmem:[#allocation7 + $0x30] sm:$0xff] }
  0x16   :  { %v196_v20 = vld [vmem:[#allocation7 + $0x28] sm:$0xff]  ;;  %v195_v21 = vld [vmem:[#allocation7 + $0x20] sm:$0xff]  ;;  %v194_v22 = vld [vmem:[#allocation7 + $0x18] sm:$0xff] }
  0x17   :  { %217 = vmatpush.msra.mxu1 %v205_v11  ;;  %v193_v23 = vld [vmem:[#allocation7 + $0x10] sm:$0xff]  ;;  %v192_v24 = vld [vmem:[#allocation7 + $0x8] sm:$0xff]  ;;  %v191_v26 = vld [vmem:[#allocation7] sm:$0xff] }
  0x18   :  { %154 = vmatpush.bf16.msra.mxu0 %v302_v2  ;;  %307 = vmatpush.bf16.msra.mxu2 %v302_v2  ;;  %v321_v27 = vld [vmem:[%s483_s2] ss:$0 sm:$0xff] }
  0x19   :  { %218 = vmatpush.msra.mxu1 %v204_v12  ;;  %v322_v56 = vld [vmem:[%s485_s4] ss:$0 sm:$0xff] }
  0x1b   :  { %219 = vmatpush.msra.mxu1 %v203_v13 }
  0x1c   :  { %155 = vmatpush.bf16.msra.mxu0 %v301_v3  ;;  %308 = vmatpush.bf16.msra.mxu2 %v301_v3 }
  0x1d   :  { %220 = vmatpush.msra.mxu1 %v202_v14 }
  0x1f   :  { %221 = vmatpush.msra.mxu1 %v201_v15 }
  0x20   :  { %156 = vmatpush.bf16.msra.mxu0 %v300_v4  ;;  %309 = vmatpush.bf16.msra.mxu2 %v300_v4 }
  0x21   :  { %222 = vmatpush.msra.mxu1 %v200_v16 }
  0x23   :  { %223 = vmatpush.msra.mxu1 %v199_v17 }
  0x24   :  { %157 = vmatpush.bf16.msra.mxu0 %v299_v5  ;;  %310 = vmatpush.bf16.msra.mxu2 %v299_v5 }
  0x25   :  { %224 = vmatpush.msra.mxu1 %v198_v18 }
  0x27   :  { %225 = vmatpush.msra.mxu1 %v197_v19 }
  0x28   :  { %158 = vmatpush.bf16.msra.mxu0 %v298_v6  ;;  %311 = vmatpush.bf16.msra.mxu2 %v298_v6 }
  0x29   :  { %226 = vmatpush.msra.mxu1 %v196_v20 }
  0x2b   :  { %227 = vmatpush.msra.mxu1 %v195_v21 }
  0x2c   :  { %159 = vmatpush.bf16.msra.mxu0 %v297_v7  ;;  %312 = vmatpush.bf16.msra.mxu2 %v297_v7 }
  0x2d   :  { %228 = vmatpush.msra.mxu1 %v194_v22 }
  0x2f   :  { %160 = vmatmul.bf16.vlgmr.msra.gmra.mxu0 %v295_v8  ;;  %165 = vmatmul.bf16.vlgmr.msra.gmra.mxu2 %v296_v9 }
  0x30   :  { %229 = vmatpush.msra.mxu1 %v193_v23 }
  0x32   :  { %230 = vmatpush.msra.mxu1 %v192_v24 }
  0x34   :  { %231 = vmatpush.msra.mxu1 %v191_v26 }
  0xac   :  { %v161_v25 = vpop.f32.mrf.mxu0 }
  0xad   :  { %v162_v29 = vadd.f32 %v321_v27, %v161_v25 }
  0xaf   :  { %v171_v32 = vmax.f32 %v162_v29, 0.0 }
  0xb2   :  { %v166_v28 = vpop.f32.mrf.mxu2 }
  0xb3   :  { %v167_v34 = vadd.f32 %v321_v27, %v166_v28 }
  0xb4   :  { %v163_v30 = vpop.f32.mrf.mxu0 }
  0xb5   :  { %v164_v31 = vadd.f32 %v321_v27, %v163_v30  ;;  %v173_v39 = vmax.f32 %v167_v34, 0.0 }
  0xb7   :  { %v172_v33 = vmax.f32 %v164_v31, 0.0 }
  0xb9   :  { %v175_v35 = vadd.f32 %v172_v33, %v171_v32 }
  0xba   :  { %v168_v36 = vpop.f32.mrf.mxu2 }
  0xbb   :  { %v176_v37 = vrot.slane %v175_v35, 4  ;;  %v169_v38 = vadd.f32 %v321_v27, %v168_v36 }
  0xbd   :  { %v177_v40 = vadd.f32 %v176_v37, %v175_v35  ;;  %v174_v41 = vmax.f32 %v169_v38, 0.0 }
  0xbf   :  { %v178_v42 = vrot.slane %v177_v40, 2  ;;  %v182_v43 = vadd.f32 %v174_v41, %v173_v39 }
  0xc1   :  { %v179_v44 = vadd.f32 %v178_v42, %v177_v40  ;;  %v183_v45 = vrot.slane %v182_v43, 4 }
  0xc3   :  { %v184_v46 = vadd.f32 %v183_v45, %v182_v43  ;;  %v180_v48 = vrot.slane %v179_v44, 1 }
  0xc5   :  { %v185_v47 = vrot.slane %v184_v46, 2  ;;  %v181_v50 = vadd.f32 %v180_v48, %v179_v44 }
  0xc7   :  { %v186_v49 = vadd.f32 %v185_v47, %v184_v46  ;;  %v189_v53 = vmul.f32 0.0625, %v181_v50 }
  0xc9   :  { %v187_v51 = vrot.slane %v186_v49, 1 }
  0xcb   :  { %v188_v52 = vadd.f32 %v187_v51, %v186_v49 }
  0xcd   :  { %v190_v54 = vmul.f32 0.0625, %v188_v52 }
  0xcf   :  { %v214_v55 = vsel %vm213_vm0, %v190_v54, %v189_v53 }
  0xd0   :  { %232 = vmatmul.f32.vlgmr.msra.gmra.mxu1 %v214_v55 }
 0x14d   :  { %v233_v57 = vpop.f32.mrf.mxu1 }
 0x14e   :  { %v234_v58 = vadd.f32 %v322_v56, %v233_v57 }
 0x150   :  { %236 = vst [vmem:[#allocation8] sm:$0x3] %v234_v58 }
 0x151   :  { %247 = dma.vmem_to_hbm [thread:$0]  %s243_s13, 32, %s245_s16, [#allocation4]  }
 0x152   :  { %423 = dma.done.wait [#allocation4], 32  }
 0x153   :  { %424 = vsyncadd [#allocation4], 4294967264 }
 0x154   :  { %252 = vsyncpa [#allocation3], 1 }
 0x155   :  { %253 = vsyncpa [#allocation6], 1 }
 0x156   :  { %254 = vsyncpa [#allocation4], 1 }

// kernel: tpu_custom_call.1
= control target key start
LH: loop header
LB: loop body
LE: loop exit
PB: predicated region body
PF: predicated region fallthrough
CT: control target
= control target key end

     0   :  { %10 = vsyncpa [#allocation3], 0  ;;  %s481_s0 = inlined_call_operand.hbm [shape: bf16[32,128], index: 0, kind: input, shape index: {}]   ;;  %s482_s1 = inlined_call_operand.hbm [shape: bf16[128,128], index: 1, kind: input, shape index: {}]   ;;  %s483_s2 = inlined_call_operand.vmem [shape: f32[1,128], index: 2, kind: input, shape index: {}]   ;;  %s484_s3 = inlined_call_operand.hbm [shape: f32[128,128], index: 3, kind: input, shape index: {}]   ;;  %s485_s4 = inlined_call_operand.vmem [shape: f32[1,128], index: 4, kind: input, shape index: {}]   ;;  %s486_s5 = inlined_call_operand.hbm [shape: f32[2,128], index: 5, kind: output, shape index: {}]  }
   0x1   :  { %11 = vsyncpa [#allocation6], 0 }
   0x2   :  { %12 = vsyncpa [#allocation4], 0  ;;  %s30_s20 = sshll.u32 %s482_s1, 4  ;;  %s425_s21 = smov [#allocation5]   ;;  %s31_s20 = int_to_ptr.hbm [resolvable:$true] %s30_s20 }
   0x3   :  { %s32_s22 = sshll.u32 %s425_s21, 4  ;;  %s17_s25 = sshll.u32 %s481_s0, 4  ;;  %s33_s22 = int_to_ptr.vmem [resolvable:$true] %s32_s22  ;;  %s18_s25 = int_to_ptr.hbm [resolvable:$true] %s17_s25 }
   0x4   :  { %s426_s26 = smov 64   ;;  %s427_s27 = smov 4  }
   0x5   :  { %38 = dma.hbm_to_vmem [thread:$0]  %s31_s20, 1024, %s33_s22, [#allocation6], %s426_s26, %s426_s26, %s427_s27  }
   0x6   :  { %s428_s28 = smov [#allocation2]   ;;  %s45_s7 = sshll.u32 %s484_s3, 4  ;;  %s46_s7 = int_to_ptr.hbm [resolvable:$true] %s45_s7 }
   0x7   :  { %s19_s29 = sshll.u32 %s428_s28, 4  ;;  %s429_s1 = smov [#allocation7]   ;;  %s20_s29 = int_to_ptr.vmem [resolvable:$true] %s19_s29 }
   0x8   :  { %25 = dma.hbm_to_vmem [thread:$0]  %s18_s25, 256, %s20_s29, [#allocation3], %s426_s26, %s426_s26, %s427_s27  }
   0x9   :  { %s47_s8 = sshll.u32 %s429_s1, 4  ;;  %s430_s9 = smov 128   ;;  %s48_s8 = int_to_ptr.vmem [resolvable:$true] %s47_s8 }
   0xa   :  { %s431_s10 = smov 8  }
   0xb   :  { %53 = dma.hbm_to_vmem [thread:$0]  %s46_s7, 2048, %s48_s8, [#allocation6], %s430_s9, %s430_s9, %s431_s10  }
   0xc   :  { %419 = dma.done.wait [#allocation3], 256  }
   0xd   :  { %420 = vsyncadd [#allocation3], 4294967040 }
   0xe   :  { %421 = dma.done.wait [#allocation6], 3072  }
   0xf   :  { %422 = vsyncadd [#allocation6], 4294964224  ;;  %v304_v0 = vld [vmem:[#allocation5 + $0x38] sm:$0xff]  ;;  %v303_v1 = vld [vmem:[#allocation5 + $0x30] sm:$0xff]  ;;  %vm213_vm0 = vcmask 1041409   ;;  %s432_s12 = smov [#allocation8]  }
  0x10   :  { %152 = vmatpush.bf16.msra.mxu0 %v304_v0  ;;  %305 = vmatpush.bf16.msra.mxu2 %v304_v0  ;;  %v302_v2 = vld [vmem:[#allocation5 + $0x28] sm:$0xff]  ;;  %v301_v3 = vld [vmem:[#allocation5 + $0x20] sm:$0xff]  ;;  %v300_v4 = vld [vmem:[#allocation5 + $0x18] sm:$0xff]  ;;  %s242_s13 = sshll.u32 %s432_s12, 4  ;;  %s244_s16 = sshll.u32 %s486_s5, 4  ;;  %s243_s13 = int_to_ptr.vmem [resolvable:$true] %s242_s13  ;;  %s245_s16 = int_to_ptr.hbm [resolvable:$true] %s244_s16 }
  0x11   :  { %v299_v5 = vld [vmem:[#allocation5 + $0x10] sm:$0xff]  ;;  %v298_v6 = vld [vmem:[#allocation5 + $0x8] sm:$0xff]  ;;  %v297_v7 = vld [vmem:[#allocation5] sm:$0xff] }
  0x12   :  { %v295_v8 = vld [vmem:[#allocation2] sm:$0xff]  ;;  %v296_v9 = vld [vmem:[#allocation2 + $0x8] sm:$0xff]  ;;  %v204_v12 = vld [vmem:[#allocation7 + $0x68] sm:$0xff] }
  0x13   :  { %v206_v10 = vld [vmem:[#allocation7 + $0x78] sm:$0xff]  ;;  %v205_v11 = vld [vmem:[#allocation7 + $0x70] sm:$0xff]  ;;  %v203_v13 = vld [vmem:[#allocation7 + $0x60] sm:$0xff] }
  0x14   :  { %153 = vmatpush.bf16.msra.mxu0 %v303_v1  ;;  %306 = vmatpush.bf16.msra.mxu2 %v303_v1  ;;  %v202_v14 = vld [vmem:[#allocation7 + $0x58] sm:$0xff]  ;;  %v201_v15 = vld [vmem:[#allocation7 + $0x50] sm:$0xff]  ;;  %v200_v16 = vld [vmem:[#allocation7 + $0x48] sm:$0xff] }
  0x15   :  { %216 = vmatpush.msra.mxu1 %v206_v10  ;;  %v199_v17 = vld [vmem:[#allocation7 + $0x40] sm:$0xff]  ;;  %v198_v18 = vld [vmem:[#allocation7 + $0x38] sm:$0xff]  ;;  %v197_v19 = vld [vmem:[#allocation7 + $0x30] sm:$0xff] }
  0x16   :  { %v196_v20 = vld [vmem:[#allocation7 + $0x28] sm:$0xff]  ;;  %v195_v21 = vld [vmem:[#allocation7 + $0x20] sm:$0xff]  ;;  %v194_v22 = vld [vmem:[#allocation7 + $0x18] sm:$0xff] }
  0x17   :  { %217 = vmatpush.msra.mxu1 %v205_v11  ;;  %v193_v23 = vld [vmem:[#allocation7 + $0x10] sm:$0xff]  ;;  %v192_v24 = vld [vmem:[#allocation7 + $0x8] sm:$0xff]  ;;  %v191_v26 = vld [vmem:[#allocation7] sm:$0xff] }
  0x18   :  { %154 = vmatpush.bf16.msra.mxu0 %v302_v2  ;;  %307 = vmatpush.bf16.msra.mxu2 %v302_v2  ;;  %v321_v27 = vld [vmem:[%s483_s2] ss:$0 sm:$0xff] }
  0x19   :  { %218 = vmatpush.msra.mxu1 %v204_v12  ;;  %v322_v56 = vld [vmem:[%s485_s4] ss:$0 sm:$0xff] }
  0x1b   :  { %219 = vmatpush.msra.mxu1 %v203_v13 }
  0x1c   :  { %155 = vmatpush.bf16.msra.mxu0 %v301_v3  ;;  %308 = vmatpush.bf16.msra.mxu2 %v301_v3 }
  0x1d   :  { %220 = vmatpush.msra.mxu1 %v202_v14 }
  0x1f   :  { %221 = vmatpush.msra.mxu1 %v201_v15 }
  0x20   :  { %156 = vmatpush.bf16.msra.mxu0 %v300_v4  ;;  %309 = vmatpush.bf16.msra.mxu2 %v300_v4 }
  0x21   :  { %222 = vmatpush.msra.mxu1 %v200_v16 }
  0x23   :  { %223 = vmatpush.msra.mxu1 %v199_v17 }
  0x24   :  { %157 = vmatpush.bf16.msra.mxu0 %v299_v5  ;;  %310 = vmatpush.bf16.msra.mxu2 %v299_v5 }
  0x25   :  { %224 = vmatpush.msra.mxu1 %v198_v18 }
  0x27   :  { %225 = vmatpush.msra.mxu1 %v197_v19 }
  0x28   :  { %158 = vmatpush.bf16.msra.mxu0 %v298_v6  ;;  %311 = vmatpush.bf16.msra.mxu2 %v298_v6 }
  0x29   :  { %226 = vmatpush.msra.mxu1 %v196_v20 }
  0x2b   :  { %227 = vmatpush.msra.mxu1 %v195_v21 }
  0x2c   :  { %159 = vmatpush.bf16.msra.mxu0 %v297_v7  ;;  %312 = vmatpush.bf16.msra.mxu2 %v297_v7 }
  0x2d   :  { %228 = vmatpush.msra.mxu1 %v194_v22 }
  0x2f   :  { %160 = vmatmul.bf16.vlgmr.msra.gmra.mxu0 %v295_v8  ;;  %165 = vmatmul.bf16.vlgmr.msra.gmra.mxu2 %v296_v9 }
  0x30   :  { %229 = vmatpush.msra.mxu1 %v193_v23 }
  0x32   :  { %230 = vmatpush.msra.mxu1 %v192_v24 }
  0x34   :  { %231 = vmatpush.msra.mxu1 %v191_v26 }
  0xac   :  { %v161_v25 = vpop.f32.mrf.mxu0 }
  0xad   :  { %v162_v29 = vadd.f32 %v321_v27, %v161_v25 }
  0xaf   :  { %v171_v32 = vmax.f32 %v162_v29, 0.0 }
  0xb2   :  { %v166_v28 = vpop.f32.mrf.mxu2 }
  0xb3   :  { %v167_v34 = vadd.f32 %v321_v27, %v166_v28 }
  0xb4   :  { %v163_v30 = vpop.f32.mrf.mxu0 }
  0xb5   :  { %v164_v31 = vadd.f32 %v321_v27, %v163_v30  ;;  %v173_v39 = vmax.f32 %v167_v34, 0.0 }
  0xb7   :  { %v172_v33 = vmax.f32 %v164_v31, 0.0 }
  0xb9   :  { %v175_v35 = vadd.f32 %v172_v33, %v171_v32 }
  0xba   :  { %v168_v36 = vpop.f32.mrf.mxu2 }
  0xbb   :  { %v176_v37 = vrot.slane %v175_v35, 4  ;;  %v169_v38 = vadd.f32 %v321_v27, %v168_v36 }
  0xbd   :  { %v177_v40 = vadd.f32 %v176_v37, %v175_v35  ;;  %v174_v41 = vmax.f32 %v169_v38, 0.0 }
  0xbf   :  { %v178_v42 = vrot.slane %v177_v40, 2  ;;  %v182_v43 = vadd.f32 %v174_v41, %v173_v39 }
  0xc1   :  { %v179_v44 = vadd.f32 %v178_v42, %v177_v40  ;;  %v183_v45 = vrot.slane %v182_v43, 4 }
  0xc3   :  { %v184_v46 = vadd.f32 %v183_v45, %v182_v43  ;;  %v180_v48 = vrot.slane %v179_v44, 1 }
  0xc5   :  { %v185_v47 = vrot.slane %v184_v46, 2  ;;  %v181_v50 = vadd.f32 %v180_v48, %v179_v44 }
  0xc7   :  { %v186_v49 = vadd.f32 %v185_v47, %v184_v46  ;;  %v189_v53 = vmul.f32 0.0625, %v181_v50 }
  0xc9   :  { %v187_v51 = vrot.slane %v186_v49, 1 }
  0xcb   :  { %v188_v52 = vadd.f32 %v187_v51, %v186_v49 }
  0xcd   :  { %v190_v54 = vmul.f32 0.0625, %v188_v52 }
  0xcf   :  { %v214_v55 = vsel %vm213_vm0, %v190_v54, %v189_v53 }
  0xd0   :  { %232 = vmatmul.f32.vlgmr.msra.gmra.mxu1 %v214_v55 }
 0x14d   :  { %v233_v57 = vpop.f32.mrf.mxu1 }
 0x14e   :  { %v234_v58 = vadd.f32 %v322_v56, %v233_v57 }
 0x150   :  { %236 = vst [vmem:[#allocation8] sm:$0x3] %v234_v58 }
 0x151   :  { %247 = dma.vmem_to_hbm [thread:$0]  %s243_s13, 32, %s245_s16, [#allocation4]  }
 0x152   :  { %423 = dma.done.wait [#allocation4], 32  }
 0x153   :  { %424 = vsyncadd [#allocation4], 4294967264 }
 0x154   :  { %252 = vsyncpa [#allocation3], 1 }
 0x155   :  { %253 = vsyncpa [#allocation6], 1 }
 0x156   :  { %254 = vsyncpa [#allocation4], 1 }

</bundles_post_ra>
